<compile_context>
chip_gen: v5e
topology: v5e:2x2
jax: 0.10.0
libtpu: 0.0.40
codegen_flags: <defaults>
</compile_context>

<pallas_src>
import jax
import jax.numpy as jnp
from jax.experimental import pallas as pl
from jax.experimental.pallas import tpu as pltpu


def _round_up(x: int, m: int) -> int:
    return ((x + m - 1) // m) * m


def _device_defaults():
    """Generation-aware tile / VMEM defaults (safe fallback if unknown)."""
    try:
        kind = jax.devices()[0].device_kind.lower()
    except Exception:
        kind = ""
    if "v7" in kind or "7x" in kind:
        # 64 MiB VMEM per TC, 2 TCs/chip: leave headroom, split token axis.
        return dict(tm=512, ti=256, vmem=56 * 1024 * 1024, two_cores=True)
    if "v6" in kind:
        # 128 MiB VMEM, ~1.4 TB/s HBM: big token tile to flip MXU-bound.
        return dict(tm=768, ti=256, vmem=96 * 1024 * 1024, two_cores=False)
    if "v5" in kind:
        # v5e is compute-bound already at modest tm.
        return dict(tm=384, ti=256, vmem=64 * 1024 * 1024, two_cores=False)
    # Unknown: conservative settings that fit every generation.
    return dict(tm=512, ti=256, vmem=56 * 1024 * 1024, two_cores=False)


def pack_chameleon_mlp_weights(w_gate, w_up, w_down, *, ti=None):
    """Pre-pack weights ONCE at load time (do NOT call per forward pass).

    w_gate/w_up: [H, I], w_down: [I, H].
    Returns:
      w_gu: (nk, H, 2*ti)  contiguous [gate_k | up_k] block per I tile
      w_dn: (nk, ti, H)    contiguous down-projection K-slice per I tile
    I is zero-padded up to a multiple of ti; padded gate/up columns and down
    rows contribute exactly 0 (silu(0)*0 = 0, zero rows add 0).
    """
    H, I = w_gate.shape
    assert w_up.shape == (H, I) and w_down.shape == (I, H)

    if ti is None:
        ti = _device_defaults()["ti"]
    if ti >= I:
        ti = I
        i_pad = I
    else:
        ti = _round_up(ti, 128)  # lane-aligned gate/up split; prefer 256
        i_pad = _round_up(I, ti)

    if i_pad != I:
        pad = i_pad - I
        w_gate = jnp.pad(w_gate, ((0, 0), (0, pad)))
        w_up = jnp.pad(w_up, ((0, 0), (0, pad)))
        w_down = jnp.pad(w_down, ((0, pad), (0, 0)))
    nk = i_pad // ti

    w_gu = jnp.concatenate(
        [w_gate.reshape(H, nk, ti), w_up.reshape(H, nk, ti)], axis=-1
    )                                            # (H, nk, 2*ti)
    w_gu = jnp.transpose(w_gu, (1, 0, 2))        # (nk, H, 2*ti) contiguous per k
    w_dn = w_down.reshape(nk, ti, H)             # (nk, ti, H)  contiguous per k
    return w_gu, w_dn


def chameleon_mlp_kernel(x_ref, wgu_ref, wd_ref, o_ref, acc_ref):
    """One (token-tile i, intermediate-tile k) step of the fused SwiGLU MLP.

    x_ref   : (tm, H)      activation tile (constant across k)
    wgu_ref : (H, 2*ti)    packed [gate_k | up_k] weight tile (leading dim squeezed)
    wd_ref  : (ti, H)      down-projection K-slice (leading dim squeezed)
    o_ref   : (tm, H)      output tile (written at the last k)
    acc_ref : (tm, H) f32  VMEM accumulator over the I (reduction) axis
    """
    k = pl.program_id(1)
    ti = wd_ref.shape[0]

    # Fused gate+up projection: one wide-N MXU pass, f32 accumulation.
    gate_up = jnp.dot(x_ref[...], wgu_ref[...],
                      preferred_element_type=jnp.float32)

    # SiluAndMul in f32 (sigmoid on the EUP slot); split is lane-aligned.
    act = jax.nn.silu(gate_up[:, :ti]) * gate_up[:, ti:]

    # Partial down-projection for this I tile.
    partial = jnp.dot(act.astype(wd_ref.dtype), wd_ref[...],
                      preferred_element_type=jnp.float32)

    @pl.when(k == 0)
    def _():
        acc_ref[...] = partial          # direct store: no zero-init write+read

    @pl.when(k > 0)
    def _():
        acc_ref[...] += partial

    @pl.when(k == pl.num_programs(1) - 1)
    def _():
        o_ref[...] = acc_ref[...].astype(o_ref.dtype)


def chameleon_mlp_packed(x, w_gu, w_dn, *, tm=None, vmem_limit_bytes=None):
    """Fused ChameleonMLP forward on PRE-PACKED weights.

    x: [T, H]; w_gu: (nk, H, 2*ti); w_dn: (nk, ti, H)  ->  [T, H]
    """
    T, H = x.shape
    nk, Hw, two_ti = w_gu.shape
    ti = two_ti // 2
    assert Hw == H and w_dn.shape == (nk, ti, H)

    defaults = _device_defaults()
    if tm is None:
        tm = defaults["tm"]
    if vmem_limit_bytes is None:
        vmem_limit_bytes = defaults["vmem"]

    # v7x: guarantee >=2 token tiles so both TensorCores get sharded work.
    if defaults["two_cores"] and T >= 16:
        tm = min(tm, _round_up(pl.cdiv(T, 2), 8))

    # Token (M) tile: multiple of 8, never larger than T.
    if tm >= T:
        tm = T
    else:
        tm = min(_round_up(tm, 8), T)

    grid = (pl.cdiv(T, tm), nk)

    # Advisory cost: weights are re-streamed once per token tile.
    n_tok_tiles = pl.cdiv(T, tm)
    i_pad = nk * ti
    x_bytes = jnp.dtype(x.dtype).itemsize
    w_bytes = jnp.dtype(w_gu.dtype).itemsize
    cost = pl.CostEstimate(
        flops=2 * T * H * 2 * i_pad + 2 * T * i_pad * H + 4 * T * i_pad,
        transcendentals=T * i_pad,
        bytes_accessed=(T * H * x_bytes                                  # x
                        + n_tok_tiles * (w_gu.size + w_dn.size) * w_bytes  # weights
                        + T * H * x_bytes),                              # output
    )

    # TODO(synk): if profiling on v6e still shows exposed weight DMA, add
    # pipeline_mode=pl.Buffered(3) on the w_gu BlockSpec (128 MiB VMEM only).
    return pl.pallas_call(
        chameleon_mlp_kernel,
        out_shape=jax.ShapeDtypeStruct((T, H), x.dtype),
        grid_spec=pltpu.PrefetchScalarGridSpec(
            num_scalar_prefetch=0,
            grid=grid,
            in_specs=[
                pl.BlockSpec((tm, H), lambda i, k: (i, 0)),            # x tile
                pl.BlockSpec((pl.Squeezed(), H, 2 * ti),               # [gate|up]
                             lambda i, k: (k, 0, 0)),
                pl.BlockSpec((pl.Squeezed(), ti, H),                   # down
                             lambda i, k: (k, 0, 0)),
            ],
            out_specs=pl.BlockSpec((tm, H), lambda i, k: (i, 0)),
            scratch_shapes=[pltpu.VMEM((tm, H), jnp.float32)],
        ),
        compiler_params=pltpu.CompilerParams(
            dimension_semantics=("parallel", "arbitrary"),
            vmem_limit_bytes=vmem_limit_bytes,
        ),
        cost_estimate=cost,
    )(x, w_gu, w_dn)


def chameleon_mlp(x, w_gate, w_up, w_down, *, tm=None, ti=None,
                  vmem_limit_bytes=None):
    """One-shot convenience wrapper (packs weights per call).

    For serving, call pack_chameleon_mlp_weights() once at weight-load time
    and reuse chameleon_mlp_packed() per forward; repacking every call roughly
    doubles HBM weight traffic.
    """
    w_gu, w_dn = pack_chameleon_mlp_weights(w_gate, w_up, w_down, ti=ti)
    return chameleon_mlp_packed(x, w_gu, w_dn, tm=tm,
                                vmem_limit_bytes=vmem_limit_bytes)


def chameleon_mlp_ref(x, w_gate, w_up, w_down):
    hi = jax.lax.Precision.HIGHEST
    gate = jnp.dot(x, w_gate, precision=hi)
    up = jnp.dot(x, w_up, precision=hi)
    act = jax.nn.silu(gate) * up
    return jnp.dot(act, w_down, precision=hi)


if __name__ == "__main__":
    key = jax.random.PRNGKey(0)

    # --- test 1: tiny single-tile case --------------------------------------
    seq, hidden, inter = 8, 32, 64
    kx, kg, ku, kd = jax.random.split(key, 4)
    x = jax.random.normal(kx, (seq, hidden), dtype=jnp.float32)
    w_gate = jax.random.normal(kg, (hidden, inter), dtype=jnp.float32) * 0.05
    w_up = jax.random.normal(ku, (hidden, inter), dtype=jnp.float32) * 0.05
    w_down = jax.random.normal(kd, (inter, hidden), dtype=jnp.float32) * 0.05

    w_gu, w_dn = pack_chameleon_mlp_weights(w_gate, w_up, w_down)   # pack ONCE
    out = jax.block_until_ready(chameleon_mlp_packed(x, w_gu, w_dn))
    ref = chameleon_mlp_ref(x, w_gate, w_up, w_down)
    assert out.shape == (seq, hidden)
    assert jnp.allclose(out, ref, atol=2e-3, rtol=2e-3), "mismatch vs ref (t1)"

    # --- test 2: multi-tile case (reduction axis, padded I, partial M tile) -
    seq2, hidden2, inter2 = 20, 128, 320
    k2 = jax.random.split(key, 8)
    x2 = jax.random.normal(k2[4], (seq2, hidden2), dtype=jnp.float32)
    wg2 = jax.random.normal(k2[5], (hidden2, inter2), dtype=jnp.float32) * 0.05
    wu2 = jax.random.normal(k2[6], (hidden2, inter2), dtype=jnp.float32) * 0.05
    wd2 = jax.random.normal(k2[7], (inter2, hidden2), dtype=jnp.float32) * 0.05

    # ti=128 -> I padded 320 -> 384, nk=3; tm=8 -> 3 token tiles (last partial).
    w_gu2, w_dn2 = pack_chameleon_mlp_weights(wg2, wu2, wd2, ti=128)
    out2 = jax.block_until_ready(chameleon_mlp_packed(x2, w_gu2, w_dn2, tm=8))
    ref2 = chameleon_mlp_ref(x2, wg2, wu2, wd2)
    assert out2.shape == (seq2, hidden2)
    assert jnp.allclose(out2, ref2, atol=2e-3, rtol=2e-3), "mismatch vs ref (t2)"

    print("KERNEL_OK")
</pallas_src>

<mosaic_0001>
module attributes {stable_mosaic.version = 11 : i64} {
  func.func @chameleon_mlp_kernel(%arg0: i32, %arg1: i32, %arg2: memref<8x32xf32, #tpu.memory_space<vmem>>, %arg3: memref<1x32x128xf32, #tpu.memory_space<vmem>>, %arg4: memref<1x64x32xf32, #tpu.memory_space<vmem>>, %arg5: memref<8x32xf32, #tpu.memory_space<vmem>>, %arg6: memref<8x32xf32, #tpu.memory_space<vmem>>) attributes {dimension_semantics = [#tpu.dimension_semantics<parallel>, #tpu.dimension_semantics<arbitrary>], iteration_bounds = array<i64: 1, 1>, scalar_prefetch = 0 : i64, scratch_operands = 1 : i64, tpu.core_type = #tpu.core_type<tc>, window_params = [{transform_indices = @transform_0, window_bounds = array<i64: 8, 32>}, {transform_indices = @transform_1, window_bounds = array<i64: 1, 32, 128>}, {transform_indices = @transform_2, window_bounds = array<i64: 1, 64, 32>}, {transform_indices = @transform_3, window_bounds = array<i64: 8, 32>}]} {
    %c0 = arith.constant 0 : index
    %c0_0 = arith.constant 0 : index
    %0 = vector.load %arg2[%c0, %c0_0] : memref<8x32xf32, #tpu.memory_space<vmem>>, vector<8x32xf32>
    %c0_1 = arith.constant 0 : index
    %c0_2 = arith.constant 0 : index
    %c0_3 = arith.constant 0 : index
    %1 = vector.load %arg3[%c0_1, %c0_2, %c0_3] : memref<1x32x128xf32, #tpu.memory_space<vmem>>, vector<1x32x128xf32>
    %2 = vector.shape_cast %1 : vector<1x32x128xf32> to vector<32x128xf32>
    %cst = arith.constant dense<0.000000e+00> : vector<8x128xf32>
    %3 = tpu.matmul %0, %2, %cst {dimension_numbers = #tpu.dot_dimension_numbers<[1], [0], [0], [1], [0, 0, 1, 1], [], []>} : vector<8x32xf32>, vector<32x128xf32>, vector<8x128xf32> -> vector<8x128xf32>
    %4 = vector.extract_strided_slice %3 {offsets = [0, 0], sizes = [8, 64], strides = [1, 1]} : vector<8x128xf32> to vector<8x64xf32>
    %5 = arith.negf %4 : vector<8x64xf32>
    %6 = math.exp %5 : vector<8x64xf32>
    %cst_4 = arith.constant 1.000000e+00 : f32
    %7 = vector.broadcast %cst_4 : f32 to vector<8x64xf32>
    %8 = arith.addf %7, %6 : vector<8x64xf32>
    %9 = arith.divf %7, %8 : vector<8x64xf32>
    %10 = arith.mulf %4, %9 : vector<8x64xf32>
    %11 = vector.extract_strided_slice %3 {offsets = [0, 64], sizes = [8, 64], strides = [1, 1]} : vector<8x128xf32> to vector<8x64xf32>
    %12 = arith.mulf %10, %11 : vector<8x64xf32>
    %c0_5 = arith.constant 0 : index
    %c0_6 = arith.constant 0 : index
    %c0_7 = arith.constant 0 : index
    %13 = vector.load %arg4[%c0_5, %c0_6, %c0_7] : memref<1x64x32xf32, #tpu.memory_space<vmem>>, vector<1x64x32xf32>
    %14 = vector.shape_cast %13 : vector<1x64x32xf32> to vector<64x32xf32>
    %cst_8 = arith.constant dense<0.000000e+00> : vector<8x32xf32>
    %15 = tpu.matmul %12, %14, %cst_8 {dimension_numbers = #tpu.dot_dimension_numbers<[1], [0], [0], [1], [0, 0, 1, 1], [], []>} : vector<8x64xf32>, vector<64x32xf32>, vector<8x32xf32> -> vector<8x32xf32>
    %c0_i32 = arith.constant 0 : i32
    %16 = arith.cmpi eq, %arg1, %c0_i32 : i32
    %17 = arith.extui %16 : i1 to i32
    %c0_i32_9 = arith.constant 0 : i32
    %18 = arith.cmpi ne, %17, %c0_i32_9 : i32
    scf.if %18 {
      %c0_14 = arith.constant 0 : index
      %c0_15 = arith.constant 0 : index
      %25 = vector.load %arg6[%c0_14, %c0_15] : memref<8x32xf32, #tpu.memory_space<vmem>>, vector<8x32xf32>
      tpu.vector_store %arg6[%c0_14, %c0_15], %15 {strides = array<i32>} : memref<8x32xf32, #tpu.memory_space<vmem>>, vector<8x32xf32>,
    } else {
    }
    %c0_i32_10 = arith.constant 0 : i32
    %19 = arith.cmpi sgt, %arg1, %c0_i32_10 : i32
    %20 = arith.extui %19 : i1 to i32
    %c0_i32_11 = arith.constant 0 : i32
    %21 = arith.cmpi ne, %20, %c0_i32_11 : i32
    scf.if %21 {
      %c0_14 = arith.constant 0 : index
      %c0_15 = arith.constant 0 : index
      %25 = vector.load %arg6[%c0_14, %c0_15] : memref<8x32xf32, #tpu.memory_space<vmem>>, vector<8x32xf32>
      %26 = arith.addf %25, %15 : vector<8x32xf32>
      %c0_16 = arith.constant 0 : index
      %c0_17 = arith.constant 0 : index
      %27 = vector.load %arg6[%c0_16, %c0_17] : memref<8x32xf32, #tpu.memory_space<vmem>>, vector<8x32xf32>
      tpu.vector_store %arg6[%c0_16, %c0_17], %26 {strides = array<i32>} : memref<8x32xf32, #tpu.memory_space<vmem>>, vector<8x32xf32>,
    } else {
    }
    %c0_i32_12 = arith.constant 0 : i32
    %22 = arith.cmpi eq, %arg1, %c0_i32_12 : i32
    %23 = arith.extui %22 : i1 to i32
    %c0_i32_13 = arith.constant 0 : i32
    %24 = arith.cmpi ne, %23, %c0_i32_13 : i32
    scf.if %24 {
      %c0_14 = arith.constant 0 : index
      %c0_15 = arith.constant 0 : index
      %25 = vector.load %arg6[%c0_14, %c0_15] : memref<8x32xf32, #tpu.memory_space<vmem>>, vector<8x32xf32>
      %c0_16 = arith.constant 0 : index
      %c0_17 = arith.constant 0 : index
      %26 = vector.load %arg5[%c0_16, %c0_17] : memref<8x32xf32, #tpu.memory_space<vmem>>, vector<8x32xf32>
      tpu.vector_store %arg5[%c0_16, %c0_17], %25 {strides = array<i32>} : memref<8x32xf32, #tpu.memory_space<vmem>>, vector<8x32xf32>,
    } else {
    }
    return
  }
  func.func @transform_0(%arg0: i32, %arg1: i32) -> (i32, i32) {
    %c0_i32 = arith.constant 0 : i32
    %c0_i32_0 = arith.constant 0 : i32
    return %arg0, %c0_i32 : i32, i32
  }
  func.func @transform_1(%arg0: i32, %arg1: i32) -> (i32, i32, i32) {
    %c0_i32 = arith.constant 0 : i32
    %c0_i32_0 = arith.constant 0 : i32
    %c0_i32_1 = arith.constant 0 : i32
    return %arg1, %c0_i32, %c0_i32_0 : i32, i32, i32
  }
  func.func @transform_2(%arg0: i32, %arg1: i32) -> (i32, i32, i32) {
    %c0_i32 = arith.constant 0 : i32
    %c0_i32_0 = arith.constant 0 : i32
    %c0_i32_1 = arith.constant 0 : i32
    return %arg1, %c0_i32, %c0_i32_0 : i32, i32, i32
  }
  func.func @transform_3(%arg0: i32, %arg1: i32) -> (i32, i32) {
    %c0_i32 = arith.constant 0 : i32
    %c0_i32_0 = arith.constant 0 : i32
    return %arg0, %c0_i32 : i32, i32
  }
}

</mosaic_0001>

<bundles_post_ra>
// kernel: tpu_custom_call.1
= control target key start
LH: loop header
LB: loop body
LE: loop exit
PB: predicated region body
PF: predicated region fallthrough
CT: control target
= control target key end

     0   :  { %s236_s0 = inlined_call_operand.vmem [shape: f32[8,32], index: 0, kind: input, shape index: {}]   ;;  %s237_s1 = inlined_call_operand.vmem [shape: f32[1,32,128], index: 1, kind: input, shape index: {}]   ;;  %s238_s2 = inlined_call_operand.vmem [shape: f32[1,64,32], index: 2, kind: input, shape index: {}]   ;;  %s239_s3 = inlined_call_operand.hbm [shape: f32[8,32], index: 3, kind: output, shape index: {}]  }
   0x1   :  { %v19_v0 = vld [vmem:[%s237_s1 + $0x18] sm:$0xff]  ;;  %v18_v1 = vld [vmem:[%s237_s1 + $0x10] sm:$0xff] }
   0x2   :  { %36 = vmatpush.msra.mxu0 %v19_v0 }
   0x3   :  { %8 = vsyncpa [#allocation4], 0  ;;  %v17_v2 = vld [vmem:[%s237_s1 + $0x8] sm:$0xff]  ;;  %v16_v3 = vld [vmem:[%s237_s1] sm:$0xff]  ;;  %vm20_vm0 = vcmask 261120   ;;  %vm77_vm5 = vcmask 523264  }
   0x4   :  { %37 = vmatpush.msra.mxu0 %v18_v1  ;;  %v15_v4 = vld [vmem:[%s236_s0] sm:$0xff]  ;;  %v76_v5 = vld [vmem:[%s238_s2 + $0x38] sm:$0xff]  ;;  %v75_v6 = vld [vmem:[%s238_s2 + $0x30] sm:$0xff]  ;;  %s169_s0 = smov 64   ;;  %s125_s13 = sshll.u32 %s239_s3, 4  ;;  %s126_s13 = int_to_ptr.hbm [resolvable:$true] %s125_s13 }
   0x5   :  { %89 = vmatpush.msra.mxu1 %v76_v5  ;;  %v74_v7 = vld [vmem:[%s238_s2 + $0x28] sm:$0xff]  ;;  %v73_v9 = vld [vmem:[%s238_s2 + $0x20] sm:$0xff]  ;;  %v72_v10 = vld [vmem:[%s238_s2 + $0x18] sm:$0xff] }
   0x6   :  { %38 = vmatpush.msra.mxu0 %v17_v2  ;;  %v71_v11 = vld [vmem:[%s238_s2 + $0x10] sm:$0xff]  ;;  %v70_v15 = vld [vmem:[%s238_s2 + $0x8] sm:$0xff]  ;;  %v69_v16 = vld [vmem:[%s238_s2] sm:$0xff]  ;;  %s170_s2 = smov [#allocation3]  }
   0x7   :  { %90 = vmatpush.msra.mxu1 %v75_v6  ;;  %s123_s10 = sshll.u32 %s170_s2, 4  ;;  %s124_s10 = int_to_ptr.vmem [resolvable:$true] %s123_s10 }
   0x8   :  { %39 = vmatpush.msra.mxu0 %v16_v3 }
   0x9   :  { %134 = vmatmul.msk.f32.vlgmr.msra.gmra.mxu0 %vm20_vm0, %v15_v4  ;;  %91 = vmatpush.msra.mxu1 %v74_v7 }
   0xb   :  { %92 = vmatpush.msra.mxu1 %v73_v9 }
   0xd   :  { %93 = vmatpush.msra.mxu1 %v72_v10 }
   0xf   :  { %94 = vmatpush.msra.mxu1 %v71_v11 }
  0x11   :  { %95 = vmatpush.msra.mxu1 %v70_v15 }
  0x13   :  { %96 = vmatpush.msra.mxu1 %v69_v16 }
  0x86   :  { %v41_v8 = vpop.f32.mrf.mxu0 }
  0x87   :  { %65 = vrot.lane.b32.xlu0 %v41_v8, %s169_s0  ;;  %v135_v12 = vmul.f32 -1.442695, %v41_v8 }
  0x89   :  { %139 = vpow2.f32 %v135_v12 }
  0x8f   :  { %v140_v13 = vpop.eup %139 }
  0x90   :  { %v47_v14 = vadd.f32 1.0, %v140_v13 }
  0x92   :  { %141 = vrcp.f32 %v47_v14  ;;  %v59_v22 = vand.u32 2147483648, %v47_v14  ;;  %vm53_vm2 = vweird.f32 %v47_v14  ;;  %v57_v23 = vand.u32 2147483647, %v47_v14 }
  0x94   :  { %v60_v25 = vor.u32 1.1754944e-38, %v59_v22  ;;  %vm58_vm4 = vcmp.eq.f32.partialorder %v57_v23, 8.507059e+37 }
  0x98   :  { %v142_v17 = vpop.eup %141 }
  0x99   :  { %v49_v18 = vmul.f32 %v142_v17, %v47_v14  ;;  %vm54_vm1 = vweird.f32 %v142_v17 }
  0x9a   :  { %vm55_vm3 = vmor %vm53_vm2, %vm54_vm1 }
  0x9b   :  { %v50_v19 = vsub.f32 1.0, %v49_v18 }
  0x9d   :  { %v51_v20 = vmul.f32 %v142_v17, %v50_v19 }
  0x9f   :  { %v52_v21 = vadd.f32 %v142_v17, %v51_v20 }
  0xa1   :  { %v56_v24 = vsel %vm55_vm3, %v142_v17, %v52_v21 }
  0xa2   :  { %v61_v26 = vsel %vm58_vm4, %v60_v25, %v56_v24 }
  0xa3   :  { %v63_v27 = vmul.f32 %v61_v26, %v41_v8 }
  0xf9   :  { %v66_v28 = vpop.permute.xlu0 %65 }
  0xfa   :  { %v68_v29 = vmul.f32 %v66_v28, %v63_v27 }
  0xfc   :  { %136 = vmatmul.msk.f32.vlgmr.msra.gmra.mxu1 %vm77_vm5, %v68_v29 }
 0x179   :  { %v98_v30 = vpop.f32.mrf.mxu1 }
 0x17a   :  { %105 = vst.msk [vmem:[#allocation2] sm:$0xff] %vm20_vm0, %v98_v30 }
 0x181   :  { %v116_v31 = vld [vmem:[#allocation2] sm:$0xff] }
 0x182   :  { %117 = vst.msk [vmem:[#allocation3] sm:$0xff] %vm20_vm0, %v116_v31 }
 0x183   :  { %128 = dma.vmem_to_hbm [thread:$0]  %s124_s10, 128, %s126_s13, [#allocation4]  }
 0x184   :  { %167 = dma.done.wait [#allocation4], 128  }
 0x185   :  { %168 = vsyncadd [#allocation4], 4294967168 }
 0x186   :  { %133 = vsyncpa [#allocation4], 1 }

</bundles_post_ra>
